<compile_context>
chip_gen: v7x
topology: tpu7x:2x2x1
jax: 0.10.0
libtpu: 0.0.40
codegen_flags: <defaults>
</compile_context>

<pallas_src>
import jax
import jax.numpy as jnp
from jax import lax
from jax.experimental import pallas as pl
from jax.experimental.pallas import tpu as pltpu

INPUT_SIZE = 4
HIDDEN_SIZE = 4
OUT_LANES = 128  # lane-dense output row width


# -----------------------------------------------------------------------------
# Single-step kernel (matches ALLSTMCell.forward exactly).
# -----------------------------------------------------------------------------
def lstm_cell_kernel(w_ref, s_ref, out_ref):
    """One LSTM step; returns sum(c_next + h_next) broadcast into a (1,128) row.

    w_ref : (I+H+1+H, 4H+H) = (13, 20) augmented matrix:
              rows 0..I+H-1 : [W_ih | W_hh]^T           (gate columns 0..4H-1)
              row  I+H      : bias_ih + bias_hh          (gate columns)
              rows I+H+1..  : identity passthrough of c  (extra H columns)
    s_ref : (13, 1) packed state column [x ; h_prev ; 1 ; c_prev]
    out_ref : (1, 128)
    """
    I, H = INPUT_SIZE, HIDDEN_SIZE

    # VPU matvec: broadcast-multiply + sublane reduce.  No MXU push/pop, no
    # in-kernel concat, and the c-passthrough columns "transpose" c_prev into
    # the same lane-dense row as the gate pre-activations for free.
    prod = s_ref[...] * w_ref[...]                       # (13, 20)  VPU
    fused = jnp.sum(prod, axis=0, keepdims=True)         # (1, 20)   sublane reduce (XLU)

    pre = fused[:, 0:4 * H]                              # (1, 16) gate pre-acts [i,f,g,o]
    c_prev = fused[:, 4 * H:5 * H]                       # (1, 4)  c_prev as a row

    # One fused EUP tanh for all four gates:
    #   sigmoid(z) = 0.5 * tanh(0.5 * z) + 0.5  on i/f/o lanes, tanh on g lanes.
    lane = lax.broadcasted_iota(jnp.int32, (1, 4 * H), 1)
    is_g = jnp.logical_and(lane >= 2 * H, lane < 3 * H)
    scale = jnp.where(is_g, 1.0, 0.5)
    t = jnp.tanh(pre * scale)                            # single EUP push over all gates
    act = jnp.where(is_g, t, 0.5 * t + 0.5)              # (1, 16)

    i = act[:, 0 * H:1 * H]
    f = act[:, 1 * H:2 * H]
    g = act[:, 2 * H:3 * H]
    o = act[:, 3 * H:4 * H]

    c_next = f * c_prev + i * g                          # (1, H)
    h_next = o * jnp.tanh(c_next)                        # (1, H)

    s = jnp.sum(h_next + c_next, keepdims=True)          # (1, 1)
    # Lane-dense store: write the whole (1,128) row once.
    out_ref[...] = jnp.broadcast_to(s, (1, OUT_LANES))


# -----------------------------------------------------------------------------
# Sequence-amortized kernel: T LSTM steps inside one pallas_call.
# -----------------------------------------------------------------------------
def lstm_seq_kernel(w_ref, x_ref, hc0_ref, out_ref):
    """Run T recurrent steps with weights VMEM-resident and h/c carried in-loop.

    w_ref   : (I+H+1, 4H) = [W_ih^T ; W_hh^T ; (b_ih + b_hh)]
    x_ref   : (T, I)  inputs, one row per timestep
    hc0_ref : (1, 2H) = [h0 | c0]
    out_ref : (1, 128) per-step sum(c_next + h_next) at lane t (written once)
    """
    I, H = INPUT_SIZE, HIDDEN_SIZE
    T = x_ref.shape[0]

    w_all = w_ref[...]                                   # loaded once for all T steps
    w_x = w_all[0:I, :]                                  # (I, 4H)
    w_h = w_all[I:I + H, :]                              # (H, 4H)
    b = w_all[I + H:I + H + 1, :]                        # (1, 4H)

    lane16 = lax.broadcasted_iota(jnp.int32, (1, 4 * H), 1)
    is_g = jnp.logical_and(lane16 >= 2 * H, lane16 < 3 * H)
    scale = jnp.where(is_g, 1.0, 0.5)
    out_lane = lax.broadcasted_iota(jnp.int32, (1, OUT_LANES), 1)

    h0 = hc0_ref[:, 0:H]                                 # (1, H)
    c0 = hc0_ref[:, H:2 * H]                             # (1, H)

    def step(t, carry):
        h, c, acc = carry
        x_t = x_ref[pl.ds(t, 1), :]                      # (1, I)
        # Two small dots accumulated (no concat).  In the recurrent loop the
        # MXU pushes pipeline across iterations; row layout avoids per-step
        # transposes of the carried h.
        pre = (jnp.dot(x_t, w_x, preferred_element_type=jnp.float32)
               + jnp.dot(h, w_h, preferred_element_type=jnp.float32)
               + b)                                       # (1, 4H)
        tt = jnp.tanh(pre * scale)                        # one EUP push per step
        act = jnp.where(is_g, tt, 0.5 * tt + 0.5)
        i = act[:, 0 * H:1 * H]
        f = act[:, 1 * H:2 * H]
        g = act[:, 2 * H:3 * H]
        o = act[:, 3 * H:4 * H]
        c_n = f * c + i * g
        h_n = o * jnp.tanh(c_n)
        s = jnp.sum(h_n + c_n, keepdims=True)             # (1, 1)
        # Deposit the per-step scalar at lane t via a one-hot mask (pure VPU);
        # the output row is stored once, lane-dense, after the loop.
        acc = acc + jnp.where(out_lane == t,
                              jnp.broadcast_to(s, (1, OUT_LANES)), 0.0)
        return h_n, c_n, acc

    init = (h0, c0, jnp.zeros((1, OUT_LANES), jnp.float32))
    _, _, acc = lax.fori_loop(0, T, step, init, unroll=True)
    out_ref[...] = acc
    # TODO(synk): on v7x, shard a batch-of-sequences grid axis across the 2
    # TensorCores with dimension_semantics=("parallel",) once batching exists.


# -----------------------------------------------------------------------------
# One-time parameter packing (NOT in the per-call path).
# -----------------------------------------------------------------------------
def prepare_cell_params(w_ih, w_hh, b_ih, b_hh):
    """Build the (I+H+1+H, 4H+H) augmented matrix for the single-step kernel."""
    I, H = INPUT_SIZE, HIDDEN_SIZE
    w_fused_t = jnp.concatenate([w_ih, w_hh], axis=1).T          # (I+H, 4H)
    b_row = (b_ih + b_hh).reshape(1, 4 * H)                      # (1, 4H)
    gate_cols = jnp.concatenate(
        [w_fused_t, b_row, jnp.zeros((H, 4 * H), jnp.float32)], axis=0)   # (13, 4H)
    pass_cols = jnp.concatenate(
        [jnp.zeros((I + H + 1, H), jnp.float32), jnp.eye(H, dtype=jnp.float32)],
        axis=0)                                                  # (13, H)
    return jnp.concatenate([gate_cols, pass_cols], axis=1).astype(jnp.float32)


def prepare_seq_params(w_ih, w_hh, b_ih, b_hh):
    """Build the (I+H+1, 4H) fused [W_ih^T ; W_hh^T ; bias] for the seq kernel."""
    w_fused_t = jnp.concatenate([w_ih, w_hh], axis=1).T          # (I+H, 4H)
    b_row = (b_ih + b_hh).reshape(1, -1)                         # (1, 4H)
    return jnp.concatenate([w_fused_t, b_row], axis=0).astype(jnp.float32)


# -----------------------------------------------------------------------------
# Wrappers.
# -----------------------------------------------------------------------------
_VMEM = pl.BlockSpec(memory_space=pltpu.MemorySpace.VMEM)


@jax.jit
def al_lstm_cell_forward(w_big, x_col, h_col, c_col):
    """Single-step module forward: returns sum(c_next + h_next) as a scalar."""
    state = jnp.concatenate(
        [x_col, h_col, jnp.ones((1, 1), jnp.float32), c_col], axis=0)   # (13, 1)
    out = pl.pallas_call(
        lstm_cell_kernel,
        out_shape=jax.ShapeDtypeStruct((1, OUT_LANES), jnp.float32),
        in_specs=[_VMEM, _VMEM],
        out_specs=_VMEM,
    )(w_big, state)
    return out[0, 0]


@jax.jit
def al_lstm_sequence_forward(w_all, x_seq_rows, h0_row, c0_row):
    """Amortized driver: T chained steps in one kernel; returns the T per-step sums."""
    T = x_seq_rows.shape[0]
    hc0 = jnp.concatenate([h0_row, c0_row], axis=1)              # (1, 2H)
    out = pl.pallas_call(
        lstm_seq_kernel,
        out_shape=jax.ShapeDtypeStruct((1, OUT_LANES), jnp.float32),
        in_specs=[_VMEM, _VMEM, _VMEM],
        out_specs=_VMEM,
    )(w_all, x_seq_rows, hc0)
    return out[0, :T]


# -----------------------------------------------------------------------------
# Pure-JAX reference mirroring the NumPy LSTMCell.forward (column layout).
# -----------------------------------------------------------------------------
def _reference_step(w_ih, w_hh, b_ih, b_hh, x_col, h_col, c_col):
    def sig(z):
        return 1.0 / (1.0 + jnp.exp(-z))

    w_ii, w_if, w_ig, w_io = jnp.split(w_ih, 4, axis=0)
    w_hi, w_hf, w_hg, w_ho = jnp.split(w_hh, 4, axis=0)
    b_ii, b_if, b_ig, b_io = jnp.split(b_ih, 4, axis=0)
    b_hi, b_hf, b_hg, b_ho = jnp.split(b_hh, 4, axis=0)

    i = sig(w_ii @ x_col + b_ii + w_hi @ h_col + b_hi)
    f = sig(w_if @ x_col + b_if + w_hf @ h_col + b_hf)
    g = jnp.tanh(w_ig @ x_col + b_ig + w_hg @ h_col + b_hg)
    o = sig(w_io @ x_col + b_io + w_ho @ h_col + b_ho)
    c_next = f * c_col + i * g
    h_next = o * jnp.tanh(c_next)
    return jnp.sum(h_next + c_next), h_next, c_next


if __name__ == "__main__":
    I, H = INPUT_SIZE, HIDDEN_SIZE
    key = jax.random.PRNGKey(0)
    k_wih, k_whh, k_x, k_h, k_c, k_seq = jax.random.split(key, 6)

    # Module init (same shapes/distributions as the reference LSTMCell).
    w_ih = jax.random.normal(k_wih, (4 * H, I), jnp.float32)
    w_hh = jax.random.normal(k_whh, (4 * H, H), jnp.float32)
    b_ih = jnp.zeros((4 * H, 1), jnp.float32)
    b_hh = jnp.zeros((4 * H, 1), jnp.float32)

    # Module's nominal inputs: x ~ randn (I,1); h_prev, c_prev = zeros.
    x_col = jax.random.normal(k_x, (I, 1), jnp.float32)
    h_col = jnp.zeros((H, 1), jnp.float32)
    c_col = jnp.zeros((H, 1), jnp.float32)

    w_big = prepare_cell_params(w_ih, w_hh, b_ih, b_hh)
    w_all = prepare_seq_params(w_ih, w_hh, b_ih, b_hh)

    # --- single-step check (module semantics) ---
    out = jax.block_until_ready(al_lstm_cell_forward(w_big, x_col, h_col, c_col))
    ref, _, _ = _reference_step(w_ih, w_hh, b_ih, b_hh, x_col, h_col, c_col)
    ref = jax.block_until_ready(ref)
    assert jnp.allclose(out, ref, rtol=1e-5, atol=1e-5), (out, ref)

    # --- single-step check with non-zero h/c (exercises the c passthrough) ---
    h_rand = jax.random.normal(k_h, (H, 1), jnp.float32)
    c_rand = jax.random.normal(k_c, (H, 1), jnp.float32)
    out2 = jax.block_until_ready(al_lstm_cell_forward(w_big, x_col, h_rand, c_rand))
    ref2, _, _ = _reference_step(w_ih, w_hh, b_ih, b_hh, x_col, h_rand, c_rand)
    assert jnp.allclose(out2, jax.block_until_ready(ref2), rtol=1e-5, atol=1e-5), (out2, ref2)

    # --- sequence-amortized check: T steps in one launch ---
    T = 8
    x_seq = jax.random.normal(k_seq, (T, I), jnp.float32)
    seq_out = jax.block_until_ready(
        al_lstm_sequence_forward(w_all, x_seq, h_col.T, c_col.T))

    ref_sums = []
    h_r, c_r = h_col, c_col
    for t in range(T):
        s_t, h_r, c_r = _reference_step(w_ih, w_hh, b_ih, b_hh,
                                        x_seq[t].reshape(I, 1), h_r, c_r)
        ref_sums.append(s_t)
    ref_seq = jax.block_until_ready(jnp.stack(ref_sums))
    assert jnp.allclose(seq_out, ref_seq, rtol=1e-5, atol=1e-5), (seq_out, ref_seq)

    # TODO(synk): @al.grad backward pass not implemented; forward-only kernels.
    print("KERNEL_OK")
</pallas_src>

<mosaic_0001>
module attributes {stable_mosaic.version = 11 : i64} {
  func.func @lstm_cell_kernel(%arg0: memref<13x20xf32, #tpu.memory_space<vmem>>, %arg1: memref<13x1xf32, #tpu.memory_space<vmem>>, %arg2: memref<1x128xf32, #tpu.memory_space<vmem>>) attributes {dimension_semantics = [], scalar_prefetch = 0 : i64, scratch_operands = 0 : i64, tpu.core_type = #tpu.core_type<tc>} {
    %c0 = arith.constant 0 : index
    %c0_0 = arith.constant 0 : index
    %0 = vector.load %arg1[%c0, %c0_0] : memref<13x1xf32, #tpu.memory_space<vmem>>, vector<13x1xf32>
    %c0_1 = arith.constant 0 : index
    %c0_2 = arith.constant 0 : index
    %1 = vector.load %arg0[%c0_1, %c0_2] : memref<13x20xf32, #tpu.memory_space<vmem>>, vector<13x20xf32>
    %2 = vector.broadcast %0 : vector<13x1xf32> to vector<13x20xf32>
    %3 = arith.mulf %2, %1 : vector<13x20xf32>
    %cst = arith.constant dense<0.000000e+00> : vector<20xf32>
    %4 = vector.multi_reduction <add>, %3, %cst [0] : vector<13x20xf32> to vector<20xf32>
    %5 = vector.shape_cast %4 : vector<20xf32> to vector<1x20xf32>
    %6 = vector.extract_strided_slice %5 {offsets = [0, 0], sizes = [1, 16], strides = [1, 1]} : vector<1x20xf32> to vector<1x16xf32>
    %7 = vector.extract_strided_slice %5 {offsets = [0, 16], sizes = [1, 4], strides = [1, 1]} : vector<1x20xf32> to vector<1x4xf32>
    %8 = tpu.iota {dimensions = array<i32: 1>} : vector<1x16xi32>
    %c8_i32 = arith.constant 8 : i32
    %9 = vector.broadcast %c8_i32 : i32 to vector<1x16xi32>
    %10 = arith.cmpi sge, %8, %9 : vector<1x16xi32>
    %c12_i32 = arith.constant 12 : i32
    %11 = vector.broadcast %c12_i32 : i32 to vector<1x16xi32>
    %12 = arith.cmpi slt, %8, %11 : vector<1x16xi32>
    %13 = arith.andi %10, %12 : vector<1x16xi1>
    %cst_3 = arith.constant 1.000000e+00 : f32
    %cst_4 = arith.constant 5.000000e-01 : f32
    %14 = vector.broadcast %cst_3 : f32 to vector<1x16xf32>
    %15 = vector.broadcast %cst_4 : f32 to vector<1x16xf32>
    %16 = arith.select %13, %14, %15 : vector<1x16xi1>, vector<1x16xf32>
    %17 = arith.mulf %6, %16 : vector<1x16xf32>
    %18 = math.tanh %17 : vector<1x16xf32>
    %cst_5 = arith.constant 5.000000e-01 : f32
    %19 = vector.broadcast %cst_5 : f32 to vector<1x16xf32>
    %20 = arith.mulf %19, %18 : vector<1x16xf32>
    %cst_6 = arith.constant 5.000000e-01 : f32
    %21 = vector.broadcast %cst_6 : f32 to vector<1x16xf32>
    %22 = arith.addf %20, %21 : vector<1x16xf32>
    %23 = arith.select %13, %18, %22 : vector<1x16xi1>, vector<1x16xf32>
    %24 = vector.extract_strided_slice %23 {offsets = [0, 0], sizes = [1, 4], strides = [1, 1]} : vector<1x16xf32> to vector<1x4xf32>
    %25 = vector.extract_strided_slice %23 {offsets = [0, 4], sizes = [1, 4], strides = [1, 1]} : vector<1x16xf32> to vector<1x4xf32>
    %26 = vector.extract_strided_slice %23 {offsets = [0, 8], sizes = [1, 4], strides = [1, 1]} : vector<1x16xf32> to vector<1x4xf32>
    %27 = vector.extract_strided_slice %23 {offsets = [0, 12], sizes = [1, 4], strides = [1, 1]} : vector<1x16xf32> to vector<1x4xf32>
    %28 = arith.mulf %25, %7 : vector<1x4xf32>
    %29 = arith.mulf %24, %26 : vector<1x4xf32>
    %30 = arith.addf %28, %29 : vector<1x4xf32>
    %31 = math.tanh %30 : vector<1x4xf32>
    %32 = arith.mulf %27, %31 : vector<1x4xf32>
    %33 = arith.addf %32, %30 : vector<1x4xf32>
    %34 = vector.shape_cast %33 : vector<1x4xf32> to vector<1x1x4xf32>
    %cst_7 = arith.constant dense<0.000000e+00> : vector<1xf32>
    %35 = vector.multi_reduction <add>, %34, %cst_7 [1, 2] : vector<1x1x4xf32> to vector<1xf32>
    %36 = vector.shape_cast %35 : vector<1xf32> to vector<1x1x1xf32>
    %37 = vector.extract %36[0, 0, 0] : f32 from vector<1x1x1xf32>
    %38 = vector.broadcast %37 : f32 to vector<1x1xf32>
    %39 = vector.shape_cast %38 : vector<1x1xf32> to vector<1x1xf32>
    %40 = vector.broadcast %39 : vector<1x1xf32> to vector<1x128xf32>
    %c0_8 = arith.constant 0 : index
    %c0_9 = arith.constant 0 : index
    %41 = vector.load %arg2[%c0_8, %c0_9] : memref<1x128xf32, #tpu.memory_space<vmem>>, vector<1x128xf32>
    tpu.vector_store %arg2[%c0_8, %c0_9], %40 {strides = array<i32>} : memref<1x128xf32, #tpu.memory_space<vmem>>, vector<1x128xf32>,
    return
  }
}

</mosaic_0001>

<bundles_post_ra>
// kernel: al_lstm_cell_forward.1
= control target key start
LH: loop header
LB: loop body
LE: loop exit
PB: predicated region body
PF: predicated region fallthrough
CT: control target
= control target key end

     0   :  { %v145_v1 = vmov 0   ;;  %s191_s0 = inlined_call_operand.vmem [shape: f32[13,20], index: 0, kind: input, shape index: {}]   ;;  %s192_s1 = inlined_call_operand.vmem [shape: f32[13,1], index: 1, kind: input, shape index: {}]   ;;  %s193_s2 = inlined_call_operand.hbm [shape: f32[1,128], index: 2, kind: output, shape index: {}]  }
   0x1   :  { %v12_v0 = vld [vmem:[%s192_s1] sm:$0xff]  ;;  %116 = vset.pattern.permute.xlu0 %v145_v1 }
   0x2   :  { %7 = vsyncpa [#allocation3], 0  ;;  %18 = vperm.xlu0 %116, %v12_v0   ;;  %v13_v2 = vld [vmem:[%s192_s1 + $0x8] sm:$0x1f]  ;;  %v14_v3 = vld [vmem:[%s191_s0] sm:$0xff]  ;;  %vm28_vm0 = vcmask 162816   ;;  %v39_v9 = vlaneseq }
   0x3   :  { %v15_v5 = vld [vmem:[%s191_s0 + $0x8] sm:$0x1f]  ;;  %vm30_vm1 = vcmask 159744   ;;  %v146_v19 = vmov 0.5   ;;  %s147_s0 = smov 120   ;;  %s148_s1 = smov 116  }
   0x4   :  { %v40_v13 = vand.u32 127, %v39_v9  ;;  %s149_s17 = smov 4   ;;  %s150_s18 = smov 8   ;;  %vm80_vm5 = vcmask 24576  }
   0x5   :  { %s151_s19 = smov [#allocation2]  }
   0x6   :  { %23 = vperm.xlu0 %116, %v13_v2   ;;  %vm41_vm2 = vcmp.ge.s32.totalorder %v40_v13, 8  ;;  %vm42_vm3 = vcmp.lt.s32.totalorder %v40_v13, 12  ;;  %s99_s20 = sshll.u32 %s151_s19, 4  ;;  %s100_s20 = int_to_ptr.vmem [resolvable:$true] %s99_s20 }
   0x7   :  { %vm43_vm4 = vmand %vm41_vm2, %vm42_vm3  ;;  %s121_s22 = scalar_lea.vmem %s100_s20, 16  ;;  %s125_s23 = scalar_lea.vmem %s100_s20, 32 }
   0x8   :  { %v44_v20 = vsel %vm43_vm4, 1.0, %v146_v19  ;;  %p122_p0 = scmp.ne.s32.totalorder %s100_s20, %s121_s22  ;;  %p126_p1 = scmp.lt.s32.totalorder %s100_s20, %s100_s20 }
   0x9   :  { %p127_p2 = scmp.lt.s32.totalorder %s125_s23, %s121_s22 }
   0xb   :  { %p128_p3 = por %p127_p2, %p126_p1 }
   0xd   :  { %p129_p4 = pnand %p128_p3, %p122_p0 }
  0x81   :  { %v19_v4 = vpop.permute.xlu0 %18 }
  0x82   :  { %v26_v6 = vmul.f32 %v19_v4, %v14_v3 }
  0x84   :  { %v29_v10 = vsel %vm28_vm0, %v26_v6, 0.0 }
  0x85   :  { %v24_v7 = vpop.permute.xlu0 %23 }
  0x86   :  { %v27_v8 = vmul.f32 %v24_v7, %v15_v5 }
  0x88   :  { %v31_v11 = vsel %vm30_vm1, %v27_v8, 0.0 }
  0x89   :  { %v32_v12 = vadd.f32 %v31_v11, %v29_v10 }
  0x8b   :  { %v33_v14 = vrot.slane %v32_v12, 4 }
  0x8d   :  { %v34_v15 = vadd.f32 %v33_v14, %v32_v12 }
  0x8f   :  { %v35_v16 = vrot.slane %v34_v15, 2 }
  0x91   :  { %v36_v17 = vadd.f32 %v35_v16, %v34_v15 }
  0x93   :  { %v37_v18 = vrot.slane %v36_v17, 1 }
  0x95   :  { %v38_v21 = vadd.f32 %v37_v18, %v36_v17 }
  0x97   :  { %v45_v22 = vmul.f32 %v44_v20, %v38_v21 }
  0x99   :  { %117 = vtanh.f32 %v45_v22 }
  0xa3   :  { %v118_v23 = vpop.eup %117 }
  0xa4   :  { %v47_v24 = vmul.f32 0.5, %v118_v23 }
  0xa6   :  { %v48_v25 = vadd.f32 0.5, %v47_v24 }
  0xa8   :  { %v49_v26 = vsel %vm43_vm4, %v118_v23, %v48_v25 }
  0xa9   :  { %56 = vrot.lane.b32.xlu1 %v49_v26, %s147_s0 }
  0xad   :  { %51 = vrot.lane.b32.xlu1 %v38_v21, %s148_s1 }
 0x11b   :  { %v57_v27 = vpop.permute.xlu1 %56 }
 0x11c   :  { %v59_v28 = vmul.f32 %v57_v27, %v49_v26 }
 0x11e   :  { %61 = vrot.lane.b32.xlu0 %v59_v28, %s149_s17 }
 0x11f   :  { %v52_v29 = vpop.permute.xlu1 %51 }
 0x120   :  { %v54_v30 = vmul.f32 %v52_v29, %v49_v26 }
 0x190   :  { %v62_v31 = vpop.permute.xlu0 %61 }
 0x191   :  { %v64_v32 = vadd.f32 %v62_v31, %v54_v30 }
 0x193   :  { %119 = vtanh.f32 %v64_v32  ;;  %72 = vrot.lane.b32.xlu0 %v64_v32, %s150_s18 }
 0x19d   :  { %v120_v33 = vpop.eup %119 }
 0x19e   :  { %67 = vrot.lane.b32.xlu1 %v120_v33, %s150_s18 }
 0x205   :  { %v73_v36 = vpop.permute.xlu0 %72 }
 0x210   :  { %v68_v34 = vpop.permute.xlu1 %67 }
 0x211   :  { %v70_v35 = vmul.f32 %v68_v34, %v49_v26 }
 0x213   :  { %v75_v37 = vadd.f32 %v73_v36, %v70_v35 }
 0x215   :  { %77 = vrot.lane.b32.xlu1 %v75_v37, %s148_s1 }
 0x287   :  { %v78_v38 = vpop.permute.xlu1 %77 }
 0x288   :  { %v81_v39 = vsel %vm80_vm5, %v78_v38, 0.0 }
 0x289   :  { %82 = vadd.xlane.f32.xlu0 %v81_v39 }
 0x316   :  { %v83_v40 = vpop.xlane.xlu0 %82 }
 0x317   :  { %v84_v41 = vrot.slane %v83_v40, 4 }
 0x319   :  { %v85_v42 = vadd.f32 %v84_v41, %v83_v40 }
 0x31b   :  { %v86_v43 = vrot.slane %v85_v42, 2 }
 0x31d   :  { %v87_v44 = vadd.f32 %v86_v43, %v85_v42 }
 0x31f   :  { %v88_v45 = vrot.slane %v87_v44, 1 }
 0x321   :  { %v89_v46 = vadd.f32 %v88_v45, %v87_v44 }
 0x323   :  { %107 = vpush %v89_v46 }
 0x354   :  { %s108_s21 = spop %107 }
 0x355   :  { %v91_v47 = vstv %s108_s21 }
 0x356   :  { %92 = vst [vmem:[#allocation2] sm:$0x1] %v91_v47 }
 0x357   :  { %132 = shalt.err (!%p129_p4)
}
 0x358   :  { %s133_s26 = scalar_lea.hbm %s193_s2, 16 }
 0x359   :  { %p134_p5 = scmp.ne.s32.totalorder %s193_s2, %s133_s26  ;;  %p137_p6 = scmp.lt.u32.totalorder %s133_s26, %s193_s2 }
 0x35b   :  { %p139_p7 = pnand %p137_p6, %p134_p5 }
 0x35d   :  { %142 = shalt.err (!%p139_p7)
}
 0x35e   :  { %102 = dma.vmem_to_hbm [thread:$0]  %s100_s20, 16, %s193_s2, [#allocation3]  }
 0x35f   :  { %143 = dma.done.wait [#allocation3], 16  }
 0x360   :  { %144 = vsyncadd [#allocation3], 4294967280 }
 0x361   :  { %106 = vsyncpa [#allocation3], 1 }

</bundles_post_ra>
